<compile_context>
chip_gen: v7x
topology: tpu7x:2x2x1
jax: 0.10.0
libtpu: 0.0.40
codegen_flags: <defaults>
</compile_context>

<pallas_src>
import jax
import jax.numpy as jnp
from jax.experimental import pallas as pl
from jax.experimental.pallas import tpu as pltpu

NODES = 100  # fixed node count per drug graph (matches reshape(batch, 100, -1))


def _process_interaction_kernel(
    abc_ref,    # (3,)            SMEM  scalar-prefetch combination params (a, b, c)
    cell_ref,   # (TB, H)         VMEM  f32
    w1_ref,     # (H, 2H)         VMEM  f32 (resident across grid)
    b1_ref,     # (1, 2H)         VMEM  f32
    w2_ref,     # (2H, H)         VMEM  f32
    b2_ref,     # (1, H)          VMEM  f32
    xa_ref,     # (TB, NODES, H)  VMEM  bf16 graphA node features
    wa_ref,     # (TB, 1, NODES)  VMEM  bf16 graphA normalized pool weights
    xb_ref,     # (TB, NODES, H)  VMEM  bf16 graphB node features
    wb_ref,     # (TB, 1, NODES)  VMEM  bf16 graphB normalized pool weights
    out_ref,    # (TB, H)         VMEM  f32
):
    # --- reaction: Linear(H, 2H) -> ReLU -> Dropout -> Linear(2H, H) (f32, MXU) ---
    cell = cell_ref[...]
    h = jnp.dot(cell, w1_ref[...], preferred_element_type=jnp.float32) + b1_ref[...]
    h = jnp.maximum(h, 0.0)
    # TODO(synk): Dropout(0.5) is identity in eval mode; train-mode stochastic masking not emitted.
    cell2 = jnp.dot(h, w2_ref[...], preferred_element_type=jnp.float32) + b2_ref[...]

    # --- masked global-mean pooling as an MXU contraction ---
    # Pool weights are already valid/(count+1e-9), so pool[b,h] = sum_n w[b,n]*x[b,n,h].
    pool_a = jnp.einsum(
        'bkn,bnh->bkh', wa_ref[...], xa_ref[...],
        preferred_element_type=jnp.float32)[:, 0, :]            # (TB, H) f32
    pool_b = jnp.einsum(
        'bkn,bnh->bkh', wb_ref[...], xb_ref[...],
        preferred_element_type=jnp.float32)[:, 0, :]            # (TB, H) f32

    # --- context combination (cell2 factored out: saves 2 full-width vmuls) ---
    a = abc_ref[0]
    b = abc_ref[1]
    c = abc_ref[2]
    out_ref[...] = cell2 * (a * pool_a + b * pool_b + c * (pool_a * pool_b))


def process_interaction(cell, w1, b1, w2, b2, xa, mask_a, xb, mask_b, abc=None,
                        *, batch_tile=8):
    """mask_a / mask_b are the ORIGINAL boolean masks (True = padded node),
    matching PyTorch's `graph.mask`. abc=None reproduces learnable=False
    (plain sum of contexts)."""
    B, H = cell.shape
    TB = batch_tile
    num_tiles = pl.cdiv(B, TB)
    Bp = num_tiles * TB

    # --- wrapper-side glue: reshape, mask normalization, dtype, batch padding ---
    def prep(x, mask):
        x3 = x.reshape(B, NODES, H)
        valid = (~mask.reshape(B, NODES)).astype(jnp.float32)
        w = valid / (jnp.sum(valid, axis=1, keepdims=True) + 1e-09)
        return x3.astype(jnp.bfloat16), w.reshape(B, 1, NODES).astype(jnp.bfloat16)

    xa3, wa = prep(xa, mask_a)
    xb3, wb = prep(xb, mask_b)
    cell_f = cell.astype(jnp.float32)

    if abc is None:  # learnable=False path
        abc = jnp.ones((3,), jnp.float32)
    abc = abc.astype(jnp.float32)

    pad = Bp - B
    if pad:
        cell_f = jnp.pad(cell_f, ((0, pad), (0, 0)))
        xa3 = jnp.pad(xa3, ((0, pad), (0, 0), (0, 0)))
        xb3 = jnp.pad(xb3, ((0, pad), (0, 0), (0, 0)))
        wa = jnp.pad(wa, ((0, pad), (0, 0), (0, 0)))
        wb = jnp.pad(wb, ((0, pad), (0, 0), (0, 0)))

    grid_spec = pltpu.PrefetchScalarGridSpec(
        num_scalar_prefetch=1,          # abc -> SMEM, passed first to kernel
        grid=(num_tiles,),
        in_specs=[
            pl.BlockSpec((TB, H), lambda i, _: (i, 0)),             # cell
            pl.BlockSpec((H, 2 * H), lambda i, _: (0, 0)),          # w1 (resident)
            pl.BlockSpec((1, 2 * H), lambda i, _: (0, 0)),          # b1
            pl.BlockSpec((2 * H, H), lambda i, _: (0, 0)),          # w2
            pl.BlockSpec((1, H), lambda i, _: (0, 0)),              # b2
            pl.BlockSpec((TB, NODES, H), lambda i, _: (i, 0, 0)),   # xa (bf16)
            pl.BlockSpec((TB, 1, NODES), lambda i, _: (i, 0, 0)),   # wa (bf16)
            pl.BlockSpec((TB, NODES, H), lambda i, _: (i, 0, 0)),   # xb (bf16)
            pl.BlockSpec((TB, 1, NODES), lambda i, _: (i, 0, 0)),   # wb (bf16)
        ],
        out_specs=pl.BlockSpec((TB, H), lambda i, _: (i, 0)),
    )

    out = pl.pallas_call(
        _process_interaction_kernel,
        out_shape=jax.ShapeDtypeStruct((Bp, H), jnp.float32),
        grid_spec=grid_spec,
        compiler_params=pltpu.CompilerParams(
            dimension_semantics=("parallel",),      # batch tiles independent (v7x dual-TC)
            vmem_limit_bytes=32 * 1024 * 1024,      # explicit scoped limit (safe on v7x)
        ),
    )(
        abc,
        cell_f,
        w1.astype(jnp.float32), b1.reshape(1, -1).astype(jnp.float32),
        w2.astype(jnp.float32), b2.reshape(1, -1).astype(jnp.float32),
        xa3, wa, xb3, wb,
    )
    return out[:B]


def _reference(cell, w1, b1, w2, b2, xa, mask_a, xb, mask_b, abc):
    """Pure-JAX f32 reference mirroring the PyTorch forward (eval mode)."""
    B, H = cell.shape
    h = jnp.maximum(cell @ w1 + b1, 0.0)
    cell2 = h @ w2 + b2

    def pool(x, m):
        x3 = x.reshape(B, NODES, H)
        valid = (~m.reshape(B, NODES, 1)).astype(jnp.float32)
        s = jnp.sum(x3 * valid, axis=1)
        cnt = jnp.sum(valid, axis=1) + 1e-09
        return s / cnt

    pa = pool(xa, mask_a)
    pb = pool(xb, mask_b)
    a, b, c = abc[0], abc[1], abc[2]
    return a * (cell2 * pa) + b * (cell2 * pb) + c * (pb * pa * cell2)


if __name__ == "__main__":
    B = 2
    H = 32  # hidden_dim; node feature dim must equal H for the elementwise products

    key = jax.random.PRNGKey(0)
    ks = jax.random.split(key, 10)

    # Deterministic "parameters" (PyTorch-style uniform(-1/sqrt(fan_in), 1/sqrt(fan_in)))
    lim1 = 1.0 / (H ** 0.5)
    lim2 = 1.0 / ((2 * H) ** 0.5)
    w1 = jax.random.uniform(ks[0], (H, 2 * H), jnp.float32, -lim1, lim1)
    b1 = jax.random.uniform(ks[1], (2 * H,), jnp.float32, -lim1, lim1)
    w2 = jax.random.uniform(ks[2], (2 * H, H), jnp.float32, -lim2, lim2)
    b2 = jax.random.uniform(ks[3], (H,), jnp.float32, -lim2, lim2)
    abc = jax.random.normal(ks[4], (3,), jnp.float32)  # learnable=True path (a, b, c)

    # Inputs
    cell = jax.random.normal(ks[5], (B, H), jnp.float32)
    xa = jax.random.normal(ks[6], (B * NODES, H), jnp.float32)
    xb = jax.random.normal(ks[7], (B * NODES, H), jnp.float32)
    mask_a = jax.random.bernoulli(ks[8], 0.3, (B * NODES,))  # True = padded/invalid node
    mask_b = jax.random.bernoulli(ks[9], 0.3, (B * NODES,))

    out = process_interaction(cell, w1, b1, w2, b2, xa, mask_a, xb, mask_b, abc)
    out = jax.block_until_ready(out)

    ref = _reference(cell, w1, b1, w2, b2, xa, mask_a, xb, mask_b, abc)
    assert out.shape == (B, H)
    # Tolerance loosened vs. the pure-f32 version: node features / pool weights
    # travel in bf16 (f32 accumulation), giving ~1e-3 relative pooling error.
    assert jnp.allclose(out, ref, rtol=2e-2, atol=2e-2), "mismatch vs reference"

    print("KERNEL_OK")
</pallas_src>

<mosaic_0001>
module attributes {stable_mosaic.version = 11 : i64} {
  func.func @_process_interaction_kernel(%arg0: i32, %arg1: memref<3xf32, #tpu.memory_space<smem>>, %arg2: memref<8x32xf32, #tpu.memory_space<vmem>>, %arg3: memref<32x64xf32, #tpu.memory_space<vmem>>, %arg4: memref<1x64xf32, #tpu.memory_space<vmem>>, %arg5: memref<64x32xf32, #tpu.memory_space<vmem>>, %arg6: memref<1x32xf32, #tpu.memory_space<vmem>>, %arg7: memref<8x100x32xbf16, #tpu.memory_space<vmem>>, %arg8: memref<8x1x100xbf16, #tpu.memory_space<vmem>>, %arg9: memref<8x100x32xbf16, #tpu.memory_space<vmem>>, %arg10: memref<8x1x100xbf16, #tpu.memory_space<vmem>>, %arg11: memref<8x32xf32, #tpu.memory_space<vmem>>) attributes {dimension_semantics = [#tpu.dimension_semantics<parallel>], iteration_bounds = array<i64: 1>, scalar_prefetch = 1 : i64, scratch_operands = 0 : i64, tpu.core_type = #tpu.core_type<tc>, window_params = [{transform_indices = @transform_0, window_bounds = array<i64: 8, 32>}, {pipeline_mode = #tpu.pipeline_mode<synchronous>, transform_indices = @transform_1, window_bounds = array<i64: 32, 64>}, {pipeline_mode = #tpu.pipeline_mode<synchronous>, transform_indices = @transform_2, window_bounds = array<i64: 1, 64>}, {pipeline_mode = #tpu.pipeline_mode<synchronous>, transform_indices = @transform_3, window_bounds = array<i64: 64, 32>}, {pipeline_mode = #tpu.pipeline_mode<synchronous>, transform_indices = @transform_4, window_bounds = array<i64: 1, 32>}, {transform_indices = @transform_5, window_bounds = array<i64: 8, 100, 32>}, {transform_indices = @transform_6, window_bounds = array<i64: 8, 1, 100>}, {transform_indices = @transform_7, window_bounds = array<i64: 8, 100, 32>}, {transform_indices = @transform_8, window_bounds = array<i64: 8, 1, 100>}, {transform_indices = @transform_9, window_bounds = array<i64: 8, 32>}]} {
    %c0 = arith.constant 0 : index
    %c0_0 = arith.constant 0 : index
    %0 = vector.load %arg2[%c0, %c0_0] : memref<8x32xf32, #tpu.memory_space<vmem>>, vector<8x32xf32>
    %c0_1 = arith.constant 0 : index
    %c0_2 = arith.constant 0 : index
    %1 = vector.load %arg3[%c0_1, %c0_2] : memref<32x64xf32, #tpu.memory_space<vmem>>, vector<32x64xf32>
    %cst = arith.constant dense<0.000000e+00> : vector<8x64xf32>
    %2 = tpu.matmul %0, %1, %cst {dimension_numbers = #tpu.dot_dimension_numbers<[1], [0], [0], [1], [0, 0, 1, 1], [], []>} : vector<8x32xf32>, vector<32x64xf32>, vector<8x64xf32> -> vector<8x64xf32>
    %c0_3 = arith.constant 0 : index
    %c0_4 = arith.constant 0 : index
    %3 = vector.load %arg4[%c0_3, %c0_4] : memref<1x64xf32, #tpu.memory_space<vmem>>, vector<1x64xf32>
    %4 = vector.broadcast %3 : vector<1x64xf32> to vector<8x64xf32>
    %5 = arith.addf %2, %4 : vector<8x64xf32>
    %cst_5 = arith.constant 0.000000e+00 : f32
    %6 = vector.broadcast %cst_5 : f32 to vector<8x64xf32>
    %7 = arith.maximumf %5, %6 : vector<8x64xf32>
    %c0_6 = arith.constant 0 : index
    %c0_7 = arith.constant 0 : index
    %8 = vector.load %arg5[%c0_6, %c0_7] : memref<64x32xf32, #tpu.memory_space<vmem>>, vector<64x32xf32>
    %cst_8 = arith.constant dense<0.000000e+00> : vector<8x32xf32>
    %9 = tpu.matmul %7, %8, %cst_8 {dimension_numbers = #tpu.dot_dimension_numbers<[1], [0], [0], [1], [0, 0, 1, 1], [], []>} : vector<8x64xf32>, vector<64x32xf32>, vector<8x32xf32> -> vector<8x32xf32>
    %c0_9 = arith.constant 0 : index
    %c0_10 = arith.constant 0 : index
    %10 = vector.load %arg6[%c0_9, %c0_10] : memref<1x32xf32, #tpu.memory_space<vmem>>, vector<1x32xf32>
    %11 = vector.broadcast %10 : vector<1x32xf32> to vector<8x32xf32>
    %12 = arith.addf %9, %11 : vector<8x32xf32>
    %c0_11 = arith.constant 0 : index
    %c0_12 = arith.constant 0 : index
    %c0_13 = arith.constant 0 : index
    %13 = vector.load %arg8[%c0_11, %c0_12, %c0_13] : memref<8x1x100xbf16, #tpu.memory_space<vmem>>, vector<8x1x100xbf16>
    %c0_14 = arith.constant 0 : index
    %c0_15 = arith.constant 0 : index
    %c0_16 = arith.constant 0 : index
    %14 = vector.load %arg7[%c0_14, %c0_15, %c0_16] : memref<8x100x32xbf16, #tpu.memory_space<vmem>>, vector<8x100x32xbf16>
    "tpu.trace_start"() <{level = 10 : i32, message = "bkn,bnh->bkh"}> : () -> ()
    %cst_17 = arith.constant dense<0.000000e+00> : vector<8x1x32xf32>
    %15 = tpu.matmul %13, %14, %cst_17 {dimension_numbers = #tpu.dot_dimension_numbers<[2], [1], [1], [2], [0, 0, 0, 1, 1, 2], [0], [0]>} : vector<8x1x100xbf16>, vector<8x100x32xbf16>, vector<8x1x32xf32> -> vector<8x1x32xf32>
    "tpu.trace_stop"() : () -> ()
    %16 = vector.shape_cast %15 : vector<8x1x32xf32> to vector<8x32xf32>
    %c0_18 = arith.constant 0 : index
    %c0_19 = arith.constant 0 : index
    %c0_20 = arith.constant 0 : index
    %17 = vector.load %arg10[%c0_18, %c0_19, %c0_20] : memref<8x1x100xbf16, #tpu.memory_space<vmem>>, vector<8x1x100xbf16>
    %c0_21 = arith.constant 0 : index
    %c0_22 = arith.constant 0 : index
    %c0_23 = arith.constant 0 : index
    %18 = vector.load %arg9[%c0_21, %c0_22, %c0_23] : memref<8x100x32xbf16, #tpu.memory_space<vmem>>, vector<8x100x32xbf16>
    "tpu.trace_start"() <{level = 10 : i32, message = "bkn,bnh->bkh"}> : () -> ()
    %cst_24 = arith.constant dense<0.000000e+00> : vector<8x1x32xf32>
    %19 = tpu.matmul %17, %18, %cst_24 {dimension_numbers = #tpu.dot_dimension_numbers<[2], [1], [1], [2], [0, 0, 0, 1, 1, 2], [0], [0]>} : vector<8x1x100xbf16>, vector<8x100x32xbf16>, vector<8x1x32xf32> -> vector<8x1x32xf32>
    "tpu.trace_stop"() : () -> ()
    %20 = vector.shape_cast %19 : vector<8x1x32xf32> to vector<8x32xf32>
    %c0_25 = arith.constant 0 : index
    %21 = memref.load %arg1[%c0_25] : memref<3xf32, #tpu.memory_space<smem>>
    %c1 = arith.constant 1 : index
    %22 = memref.load %arg1[%c1] : memref<3xf32, #tpu.memory_space<smem>>
    %c2 = arith.constant 2 : index
    %23 = memref.load %arg1[%c2] : memref<3xf32, #tpu.memory_space<smem>>
    %24 = vector.broadcast %21 : f32 to vector<8x32xf32>
    %25 = arith.mulf %24, %16 : vector<8x32xf32>
    %26 = vector.broadcast %22 : f32 to vector<8x32xf32>
    %27 = arith.mulf %26, %20 : vector<8x32xf32>
    %28 = arith.addf %25, %27 : vector<8x32xf32>
    %29 = arith.mulf %16, %20 : vector<8x32xf32>
    %30 = vector.broadcast %23 : f32 to vector<8x32xf32>
    %31 = arith.mulf %30, %29 : vector<8x32xf32>
    %32 = arith.addf %28, %31 : vector<8x32xf32>
    %33 = arith.mulf %12, %32 : vector<8x32xf32>
    %c0_26 = arith.constant 0 : index
    %c0_27 = arith.constant 0 : index
    %34 = vector.load %arg11[%c0_26, %c0_27] : memref<8x32xf32, #tpu.memory_space<vmem>>, vector<8x32xf32>
    tpu.vector_store %arg11[%c0_26, %c0_27], %33 {strides = array<i32>} : memref<8x32xf32, #tpu.memory_space<vmem>>, vector<8x32xf32>,
    return
  }
  func.func @transform_0(%arg0: i32, %arg1: memref<3xf32, #tpu.memory_space<smem>>) -> (i32, i32) {
    %c0_i32 = arith.constant 0 : i32
    %c0_i32_0 = arith.constant 0 : i32
    return %arg0, %c0_i32 : i32, i32
  }
  func.func @transform_1(%arg0: i32, %arg1: memref<3xf32, #tpu.memory_space<smem>>) -> (i32, i32) {
    %c0_i32 = arith.constant 0 : i32
    %c0_i32_0 = arith.constant 0 : i32
    %c0_i32_1 = arith.constant 0 : i32
    return %c0_i32, %c0_i32_0 : i32, i32
  }
  func.func @transform_2(%arg0: i32, %arg1: memref<3xf32, #tpu.memory_space<smem>>) -> (i32, i32) {
    %c0_i32 = arith.constant 0 : i32
    %c0_i32_0 = arith.constant 0 : i32
    %c0_i32_1 = arith.constant 0 : i32
    return %c0_i32, %c0_i32_0 : i32, i32
  }
  func.func @transform_3(%arg0: i32, %arg1: memref<3xf32, #tpu.memory_space<smem>>) -> (i32, i32) {
    %c0_i32 = arith.constant 0 : i32
    %c0_i32_0 = arith.constant 0 : i32
    %c0_i32_1 = arith.constant 0 : i32
    return %c0_i32, %c0_i32_0 : i32, i32
  }
  func.func @transform_4(%arg0: i32, %arg1: memref<3xf32, #tpu.memory_space<smem>>) -> (i32, i32) {
    %c0_i32 = arith.constant 0 : i32
    %c0_i32_0 = arith.constant 0 : i32
    %c0_i32_1 = arith.constant 0 : i32
    return %c0_i32, %c0_i32_0 : i32, i32
  }
  func.func @transform_5(%arg0: i32, %arg1: memref<3xf32, #tpu.memory_space<smem>>) -> (i32, i32, i32) {
    %c0_i32 = arith.constant 0 : i32
    %c0_i32_0 = arith.constant 0 : i32
    %c0_i32_1 = arith.constant 0 : i32
    return %arg0, %c0_i32, %c0_i32_0 : i32, i32, i32
  }
  func.func @transform_6(%arg0: i32, %arg1: memref<3xf32, #tpu.memory_space<smem>>) -> (i32, i32, i32) {
    %c0_i32 = arith.constant 0 : i32
    %c0_i32_0 = arith.constant 0 : i32
    %c0_i32_1 = arith.constant 0 : i32
    return %arg0, %c0_i32, %c0_i32_0 : i32, i32, i32
  }
  func.func @transform_7(%arg0: i32, %arg1: memref<3xf32, #tpu.memory_space<smem>>) -> (i32, i32, i32) {
    %c0_i32 = arith.constant 0 : i32
    %c0_i32_0 = arith.constant 0 : i32
    %c0_i32_1 = arith.constant 0 : i32
    return %arg0, %c0_i32, %c0_i32_0 : i32, i32, i32
  }
  func.func @transform_8(%arg0: i32, %arg1: memref<3xf32, #tpu.memory_space<smem>>) -> (i32, i32, i32) {
    %c0_i32 = arith.constant 0 : i32
    %c0_i32_0 = arith.constant 0 : i32
    %c0_i32_1 = arith.constant 0 : i32
    return %arg0, %c0_i32, %c0_i32_0 : i32, i32, i32
  }
  func.func @transform_9(%arg0: i32, %arg1: memref<3xf32, #tpu.memory_space<smem>>) -> (i32, i32) {
    %c0_i32 = arith.constant 0 : i32
    %c0_i32_0 = arith.constant 0 : i32
    return %arg0, %c0_i32 : i32, i32
  }
}

</mosaic_0001>

<bundles_post_ra>
// kernel: tpu_custom_call.1
= control target key start
LH: loop header
LB: loop body
LE: loop exit
PB: predicated region body
PF: predicated region fallthrough
CT: control target
= control target key end

     0   :  { %s3413_s0 = inlined_call_operand.vmem [shape: f32[3], index: 0, kind: input, shape index: {}]   ;;  %s3414_s1 = inlined_call_operand.vmem [shape: f32[8,32], index: 1, kind: input, shape index: {}]   ;;  %s3415_s2 = inlined_call_operand.vmem [shape: f32[32,64], index: 2, kind: input, shape index: {}]   ;;  %s3416_s3 = inlined_call_operand.vmem [shape: f32[1,64], index: 3, kind: input, shape index: {}]   ;;  %s3417_s4 = inlined_call_operand.vmem [shape: f32[64,32], index: 4, kind: input, shape index: {}]   ;;  %s3418_s5 = inlined_call_operand.vmem [shape: f32[1,32], index: 5, kind: input, shape index: {}]   ;;  %s3419_s6 = inlined_call_operand.vmem [shape: bf16[8,100,32], index: 6, kind: input, shape index: {}]   ;;  %s3420_s7 = inlined_call_operand.vmem [shape: bf16[8,1,100], index: 7, kind: input, shape index: {}]   ;;  %s3421_s8 = inlined_call_operand.vmem [shape: bf16[8,100,32], index: 8, kind: input, shape index: {}]   ;;  %s3422_s9 = inlined_call_operand.vmem [shape: bf16[8,1,100], index: 9, kind: input, shape index: {}]   ;;  %s3423_s10 = inlined_call_operand.hbm [shape: f32[8,32], index: 10, kind: output, shape index: {}]  }
   0x1   :  { %s15_s15 = sshll.u32 %s3413_s0, 4  ;;  %s16_s15 = int_to_ptr.vmem [resolvable:$true] %s15_s15 }
   0x2   :  { %s2632_s16 = scalar_lea.vmem %s16_s15, 16  ;;  %p2637_p1 = scmp.lt.s32.totalorder %s16_s15, %s16_s15 }
   0x3   :  { %p2633_p0 = scmp.ne.s32.totalorder %s16_s15, %s2632_s16  ;;  %p2638_p2 = scmp.lt.s32.totalorder %s2632_s16, %s2632_s16 }
   0x5   :  { %p2639_p3 = por %p2638_p2, %p2637_p1 }
   0x7   :  { %p2640_p4 = pnand %p2639_p3, %p2633_p0 }
   0x9   :  { %2643 = shalt.err (!%p2640_p4)  }
   0xa   :  { %s2670_s17 = smov [#allocation3]  }
   0xb   :  { %18 = dma.vmem_to_smem %s16_s15, 16, %s2670_s17, [#allocation2] }
   0xc   :  { %2666 = dma.done.wait [#allocation2], 16 }
   0xd   :  { %2667 = vsyncadd [#allocation2], 4294967280 }
   0xe   :  { %20 = sfence }
   0xf   :  { %v42_v0 = vld [vmem:[%s3415_s2] sm:$0xff]  ;;  %v43_v1 = vld [vmem:[%s3415_s2 + $0x8] sm:$0xff]  ;;  %v44_v2 = vld [vmem:[%s3415_s2 + $0x10] sm:$0xff]  ;;  %v2671_v3 = vmov 0.0|0.0   ;;  %vm2672_vm0 = vmmov 0   ;;  %v2673_v6 = vmov 0.0  }
  0x10   :  { %2497 = vmatprep.subr.bf16.mxu0 %v2671_v3  ;;  %v2498_v4 = vpack.c.bf16 %v43_v1, %v42_v0  ;;  %v45_v5 = vld [vmem:[%s3415_s2 + $0x18] sm:$0xff]  ;;  %2187 = vmatprep.mubr.msk.f32.mxu0 %vm2672_vm0, %v2673_v6  ;;  %v41_v8 = vld [vmem:[%s3414_s1] sm:$0xff]  ;;  %vm53_vm1 = vcmask 261120   ;;  %v2521_v10 = vld [vmem:[%s3419_s6 + $0x8] sm:$0xff]   ;;  %vm372_vm2 = vcmask 1041408   ;;  %vm368_vm3 = vcmask 818176  }
  0x11   :  { %2503 = vmatprep.subr.bf16.mxu1 %v2671_v3  ;;  %2206 = vmatprep.mubr.msk.f32.mxu1 %vm2672_vm0, %v2673_v6  ;;  %v2501_v7 = vpack.c.bf16 %v45_v5, %v44_v2  ;;  %v2520_v9 = vld [vmem:[%s3419_s6] sm:$0xff]   ;;  %v2522_v11 = vld [vmem:[%s3419_s6 + $0x10] sm:$0xff]   ;;  %v2523_v12 = vld [vmem:[%s3419_s6 + $0x18] sm:$0xff]  }
  0x12   :  { %2499 = vmatpush3.bf16.msra.mxu0 %v2498_v4  ;;  %v2524_v13 = vld [vmem:[%s3419_s6 + $0x20] sm:$0xff]   ;;  %v2526_v14 = vld [vmem:[%s3419_s6 + $0x30] ss:$0 sps:$4 sm:$0x33]   ;;  %v129_v17 = vld [vmem:[%s3417_s4 + $0x8] sm:$0xff] }
  0x13   :  { %2500 = vmatprep.subr.bf16.mxu0 %v2671_v3  ;;  %v2533_v15 = vld [vmem:[%s3419_s6 + $0x98] ss:$0 sps:$4 sm:$0x33]   ;;  %v128_v16 = vld [vmem:[%s3417_s4] sm:$0xff]  ;;  %v2525_v18 = vld [vmem:[%s3419_s6 + $0x28] sm:$0xff]   ;;  %v374_v23 = vsel %vm372_vm2, %v2526_v14, 0 }
  0x14   :  { %v2504_v19 = vpack.c.bf16 %v129_v17, %v128_v16  ;;  %v130_v20 = vld [vmem:[%s3417_s4 + $0x10] sm:$0xff]  ;;  %v131_v21 = vld [vmem:[%s3417_s4 + $0x18] sm:$0xff]  ;;  %v544_v24 = vsel %vm372_vm2, %v2533_v15, 0  ;;  %v132_v25 = vld [vmem:[%s3417_s4 + $0x20] sm:$0xff] }
  0x15   :  { %v2507_v22 = vpack.c.bf16 %v131_v21, %v130_v20  ;;  %v133_v26 = vld [vmem:[%s3417_s4 + $0x28] sm:$0xff]  ;;  %v217_v27 = vld [vmem:[%s3420_s7] sm:$0x1]  ;;  %v2528_v30 = vld [vmem:[%s3419_s6 + $0x70] sm:$0xff]  }
  0x16   :  { %2502 = vmatpush3.bf16.msra.mxu0 %v2501_v7  ;;  %2505 = vmatpush3.bf16.msra.mxu1 %v2504_v19  ;;  %v2527_v28 = vld [vmem:[%s3419_s6 + $0x68] sm:$0xff]   ;;  %v2510_v29 = vpack.c.bf16 %v133_v26, %v132_v25  ;;  %v2529_v31 = vld [vmem:[%s3419_s6 + $0x78] sm:$0xff]   ;;  %v2530_v32 = vld [vmem:[%s3419_s6 + $0x80] sm:$0xff]  }
  0x17   :  { %2209 = vmatprep.subr.bf16.mxu0 %v2673_v6  ;;  %2506 = vmatprep.subr.bf16.mxu1 %v2671_v3  ;;  %v2531_v33 = vld [vmem:[%s3419_s6 + $0x88] sm:$0xff]   ;;  %v2532_v34 = vld [vmem:[%s3419_s6 + $0x90] sm:$0xff]   ;;  %v219_v35 = vld [vmem:[%s3420_s7 + $0x2] sm:$0x1] }
  0x18   :  { %v2534_v36 = vld [vmem:[%s3419_s6 + $0xd0] sm:$0xff]   ;;  %v2535_v37 = vld [vmem:[%s3419_s6 + $0xd8] sm:$0xff]   ;;  %v2536_v38 = vld [vmem:[%s3419_s6 + $0xe0] sm:$0xff]  }
  0x19   :  { %2188 = vmatmul.mubr.msk.f32.vlgmr.msra.gmra.mrb[0].mxu0 %vm53_vm1, %v41_v8  ;;  %v2537_v39 = vld [vmem:[%s3419_s6 + $0xe8] sm:$0xff]   ;;  %v2538_v40 = vld [vmem:[%s3419_s6 + $0xf0] sm:$0xff]   ;;  %v2539_v41 = vld [vmem:[%s3419_s6 + $0xf8] sm:$0xff]  }
  0x1a   :  { %2210 = vmatpush3.bf16.msra.mxu0 %v2520_v9  ;;  %2223 = vmatprep.mubr.msk.bf16.mxu0 %vm2672_vm0, %v2673_v6 }
  0x1b   :  { %2211 = vmatprep.subr.bf16.mxu0 %v2673_v6  ;;  %2508 = vmatpush3.bf16.msra.mxu1 %v2507_v22 }
  0x1c   :  { %2509 = vmatprep.subr.bf16.mxu1 %v2671_v3 }
  0x1e   :  { %2212 = vmatpush3.bf16.msra.mxu0 %v2521_v10 }
  0x1f   :  { %2213 = vmatprep.subr.bf16.mxu0 %v2673_v6  ;;  %2511 = vmatpush3.bf16.msra.mxu1 %v2510_v29 }
  0x20   :  { %2512 = vmatprep.subr.bf16.mxu1 %v2671_v3 }
  0x22   :  { %2214 = vmatpush3.bf16.msra.mxu0 %v2522_v11 }
  0x23   :  { %2215 = vmatprep.subr.bf16.mxu0 %v2673_v6 }
  0x26   :  { %2216 = vmatpush3.bf16.msra.mxu0 %v2523_v12 }
  0x27   :  { %2217 = vmatprep.subr.bf16.mxu0 %v2673_v6 }
  0x2a   :  { %2218 = vmatpush3.bf16.msra.mxu0 %v2524_v13 }
  0x2b   :  { %2219 = vmatprep.subr.bf16.mxu0 %v2673_v6 }
  0x2e   :  { %2220 = vmatpush3.bf16.msra.mxu0 %v2525_v18 }
  0x2f   :  { %2221 = vmatprep.subr.bf16.mxu0 %v2673_v6 }
  0x32   :  { %2222 = vmatpush3.bf16.msra.mxu0 %v374_v23 }
  0x33   :  { %2245 = vmatprep.subr.bf16.mxu0 %v2673_v6 }
  0x35   :  { %2224 = vmatmul.mubr.msk.bf16.vlgmr.msra.gmra.mrb[4].mxu0 %vm368_vm3, %v217_v27 }
  0x36   :  { %2246 = vmatpush3.bf16.msra.mxu0 %v2527_v28  ;;  %2259 = vmatprep.mubr.msk.bf16.mxu0 %vm2672_vm0, %v2673_v6 }
  0x37   :  { %2247 = vmatprep.subr.bf16.mxu0 %v2673_v6 }
  0x3a   :  { %2248 = vmatpush3.bf16.msra.mxu0 %v2528_v30 }
  0x3b   :  { %2249 = vmatprep.subr.bf16.mxu0 %v2673_v6 }
  0x3e   :  { %2250 = vmatpush3.bf16.msra.mxu0 %v2529_v31 }
  0x3f   :  { %2251 = vmatprep.subr.bf16.mxu0 %v2673_v6 }
  0x42   :  { %2252 = vmatpush3.bf16.msra.mxu0 %v2530_v32 }
  0x43   :  { %2253 = vmatprep.subr.bf16.mxu0 %v2673_v6 }
  0x46   :  { %2254 = vmatpush3.bf16.msra.mxu0 %v2531_v33 }
  0x47   :  { %2255 = vmatprep.subr.bf16.mxu0 %v2673_v6 }
  0x4a   :  { %2256 = vmatpush3.bf16.msra.mxu0 %v2532_v34 }
  0x4b   :  { %2257 = vmatprep.subr.bf16.mxu0 %v2673_v6 }
  0x4e   :  { %2258 = vmatpush3.bf16.msra.mxu0 %v544_v24 }
  0x4f   :  { %2281 = vmatprep.subr.bf16.mxu0 %v2673_v6 }
  0x51   :  { %2260 = vmatmul.mubr.msk.bf16.vlgmr.msra.gmra.mrb[8].mxu0 %vm368_vm3, %v219_v35 }
  0x52   :  { %2282 = vmatpush3.bf16.msra.mxu0 %v2534_v36  ;;  %2295 = vmatprep.mubr.msk.bf16.mxu0 %vm2672_vm0, %v2673_v6 }
  0x53   :  { %2283 = vmatprep.subr.bf16.mxu0 %v2673_v6 }
  0x56   :  { %2284 = vmatpush3.bf16.msra.mxu0 %v2535_v37 }
  0x57   :  { %2285 = vmatprep.subr.bf16.mxu0 %v2673_v6 }
  0x5a   :  { %2286 = vmatpush3.bf16.msra.mxu0 %v2536_v38 }
  0x5b   :  { %2287 = vmatprep.subr.bf16.mxu0 %v2673_v6 }
  0x5e   :  { %2288 = vmatpush3.bf16.msra.mxu0 %v2537_v39 }
  0x5f   :  { %2289 = vmatprep.subr.bf16.mxu0 %v2673_v6 }
  0x62   :  { %2290 = vmatpush3.bf16.msra.mxu0 %v2538_v40 }
  0x63   :  { %21 = vsyncpa [#allocation5], 0  ;;  %2291 = vmatprep.subr.bf16.mxu0 %v2673_v6  ;;  %v2540_v42 = vld [vmem:[%s3419_s6 + $0x100] ss:$0 sps:$4 sm:$0x33]   ;;  %v2541_v45 = vld [vmem:[%s3419_s6 + $0x138] sm:$0xff]  }
  0x64   :  { %v714_v43 = vsel %vm372_vm2, %v2540_v42, 0  ;;  %v221_v44 = vld [vmem:[%s3420_s7 + $0x4] sm:$0x1]  ;;  %v134_v46 = vld [vmem:[%s3417_s4 + $0x30] sm:$0xff]  ;;  %v135_v47 = vld [vmem:[%s3417_s4 + $0x38] sm:$0xff]  ;;  %vm143_vm4 = vcmask 523264  }
  0x65   :  { %v2513_v48 = vpack.c.bf16 %v135_v47, %v134_v46  ;;  %v2542_v49 = vld [vmem:[%s3419_s6 + $0x140] sm:$0xff]   ;;  %v2543_v50 = vld [vmem:[%s3419_s6 + $0x148] sm:$0xff]   ;;  %v2544_v51 = vld [vmem:[%s3419_s6 + $0x150] sm:$0xff]   ;;  %s1803_s26 = sld [smem:[#allocation3]]  ;;  %s2035_s2 = sld [smem:[#allocation3 + $0x1]]  ;;  %vm1866_vm5 = vcmask 1041409  }
  0x66   :  { %2292 = vmatpush3.bf16.msra.mxu0 %v2539_v41  ;;  %v2545_v52 = vld [vmem:[%s3419_s6 + $0x158] sm:$0xff]   ;;  %v2546_v53 = vld [vmem:[%s3419_s6 + $0x160] sm:$0xff]   ;;  %v2547_v54 = vld [vmem:[%s3419_s6 + $0x168] ss:$0 sps:$4 sm:$0x33]   ;;  %s2036_s28 = sld [smem:[#allocation3 + $0x2]] }
  0x67   :  { %2293 = vmatprep.subr.bf16.mxu0 %v2673_v6  ;;  %2514 = vmatpush3.bf16.msra.mxu1 %v2513_v48  ;;  %v884_v55 = vsel %vm372_vm2, %v2547_v54, 0  ;;  %v223_v56 = vld [vmem:[%s3420_s7 + $0x6] sm:$0x1]  ;;  %v2551_v58 = vld [vmem:[%s3421_s8 + $0x8] sm:$0xff]   ;;  %v2553_v59 = vld [vmem:[%s3421_s8 + $0x10] sm:$0xff]   ;;  %vm1869_vm6 = vcmask 1042434  }
  0x68   :  { %2227 = vmatprep.subr.bf16.mxu1 %v2673_v6  ;;  %v2549_v57 = vld [vmem:[%s3421_s8] sm:$0xff]   ;;  %v2555_v60 = vld [vmem:[%s3421_s8 + $0x18] sm:$0xff]   ;;  %v2559_v62 = vld [vmem:[%s3421_s8 + $0x28] sm:$0xff]   ;;  %vm1872_vm7 = vcmask 1043459   ;;  %vm1875_vm8 = vcmask 1044484   ;;  %vm1878_vm9 = vcmask 1045509  }
  0x69   :  { %v2557_v61 = vld [vmem:[%s3421_s8 + $0x20] sm:$0xff]   ;;  %v2561_v63 = vld [vmem:[%s3421_s8 + $0x30] ss:$0 sps:$4 sm:$0x33]   ;;  %v2563_v2 = vld [vmem:[%s3421_s8 + $0x68] sm:$0xff]   ;;  %vm1881_vm10 = vcmask 1046534  }
  0x6a   :  { %2294 = vmatpush3.bf16.msra.mxu0 %v714_v43  ;;  %v1166_v0 = vsel %vm372_vm2, %v2561_v63, 0  ;;  %v1011_v1 = vld [vmem:[%s3422_s9] sm:$0x1]  ;;  %v2565_v3 = vld [vmem:[%s3421_s8 + $0x70] sm:$0xff]   ;;  %v2567_v4 = vld [vmem:[%s3421_s8 + $0x78] sm:$0xff]   ;;  %vm1884_vm11 = vcmask 1047559  }
  0x6b   :  { %2317 = vmatprep.subr.bf16.mxu0 %v2673_v6  ;;  %v2569_v5 = vld [vmem:[%s3421_s8 + $0x80] sm:$0xff]   ;;  %v2571_v7 = vld [vmem:[%s3421_s8 + $0x88] sm:$0xff]   ;;  %v2573_v8 = vld [vmem:[%s3421_s8 + $0x90] sm:$0xff]   ;;  %s2674_s29 = smov [#allocation4]  }
  0x6c   :  { %v2575_v9 = vld [vmem:[%s3421_s8 + $0x98] ss:$0 sps:$4 sm:$0x33]   ;;  %v1013_v11 = vld [vmem:[%s3422_s9 + $0x2] sm:$0x1]  ;;  %v2577_v12 = vld [vmem:[%s3421_s8 + $0xd0] sm:$0xff]  }
  0x6d   :  { %2296 = vmatmul.mubr.msk.bf16.vlgmr.msra.gmra.mrb[12].mxu0 %vm368_vm3, %v221_v44  ;;  %v1336_v10 = vsel %vm372_vm2, %v2575_v9, 0  ;;  %v2579_v13 = vld [vmem:[%s3421_s8 + $0xd8] sm:$0xff]   ;;  %v2581_v14 = vld [vmem:[%s3421_s8 + $0xe0] sm:$0xff]   ;;  %v2583_v15 = vld [vmem:[%s3421_s8 + $0xe8] sm:$0xff]   ;;  %s1895_s1 = sshll.u32 %s2674_s29, 4  ;;  %s1896_s1 = int_to_ptr.vmem [resolvable:$true] %s1895_s1 }
  0x6e   :  { %2318 = vmatpush3.bf16.msra.mxu0 %v2541_v45  ;;  %2331 = vmatprep.mubr.msk.bf16.mxu0 %vm2672_vm0, %v2673_v6  ;;  %v2585_v16 = vld [vmem:[%s3421_s8 + $0xf0] sm:$0xff]   ;;  %v2587_v17 = vld [vmem:[%s3421_s8 + $0xf8] sm:$0xff]   ;;  %v2589_v18 = vld [vmem:[%s3421_s8 + $0x100] ss:$0 sps:$4 sm:$0x33]   ;;  %s2644_s30 = scalar_lea.vmem %s1896_s1, 128  ;;  %p2649_p6 = scmp.lt.s32.totalorder %s1896_s1, %s1896_s1 }
  0x6f   :  { %2319 = vmatprep.subr.bf16.mxu0 %v2673_v6  ;;  %v1506_v19 = vsel %vm372_vm2, %v2589_v18, 0  ;;  %v1015_v20 = vld [vmem:[%s3422_s9 + $0x4] sm:$0x1]  ;;  %v2591_v21 = vld [vmem:[%s3421_s8 + $0x138] sm:$0xff]   ;;  %v2595_v23 = vld [vmem:[%s3421_s8 + $0x148] sm:$0xff]   ;;  %p2645_p5 = scmp.ne.s32.totalorder %s1896_s1, %s2644_s30  ;;  %p2650_p7 = scmp.lt.s32.totalorder %s2644_s30, %s2644_s30 }
  0x70   :  { %v2593_v22 = vld [vmem:[%s3421_s8 + $0x140] sm:$0xff]   ;;  %v2597_v24 = vld [vmem:[%s3421_s8 + $0x150] sm:$0xff]   ;;  %v2599_v26 = vld [vmem:[%s3421_s8 + $0x158] sm:$0xff]  }
  0x71   :  { %v1903_v25 = vld [vmem:[%s3416_s3] ss:$0 sm:$0xff]  ;;  %v2548_v30 = vld [vmem:[%s3419_s6 + $0x34] sm:$0xff]   ;;  %v2603_v33 = vld [vmem:[%s3421_s8 + $0x168] ss:$0 sps:$4 sm:$0x33]   ;;  %p2651_p8 = por %p2650_p7, %p2649_p6 }
  0x72   :  { %2320 = vmatpush3.bf16.msra.mxu0 %v2542_v49  ;;  %v2601_v32 = vld [vmem:[%s3421_s8 + $0x160] sm:$0xff]   ;;  %v1676_v35 = vsel %vm372_vm2, %v2603_v33, 0  ;;  %v2554_v38 = vld [vmem:[%s3419_s6 + $0x4c] sm:$0xff]   ;;  %v2556_v39 = vld [vmem:[%s3419_s6 + $0x54] sm:$0xff]  }
  0x73   :  { %2321 = vmatprep.subr.bf16.mxu0 %v2673_v6  ;;  %v2550_v34 = vld [vmem:[%s3419_s6 + $0x3c] sm:$0xff]   ;;  %v2552_v36 = vld [vmem:[%s3419_s6 + $0x44] sm:$0xff]   ;;  %v2566_v46 = vld [vmem:[%s3419_s6 + $0xac] sm:$0xff]   ;;  %p2652_p9 = pnand %p2651_p8, %p2645_p5 }
  0x74   :  { %v1017_v37 = vld [vmem:[%s3422_s9 + $0x6] sm:$0x1]  ;;  %v2558_v40 = vld [vmem:[%s3419_s6 + $0x5c] sm:$0xff]   ;;  %v2560_v41 = vld [vmem:[%s3419_s6 + $0x64] ss:$0 sps:$4 sm:$0x33]  }
  0x75   :  { %v459_v42 = vsel %vm372_vm2, %v2560_v41, 0  ;;  %v218_v43 = vld [vmem:[%s3420_s7 + $0x1] sm:$0x1]  ;;  %v2564_v45 = vld [vmem:[%s3419_s6 + $0xa4] sm:$0xff]   ;;  %v2568_v47 = vld [vmem:[%s3419_s6 + $0xb4] sm:$0xff]  }
  0x76   :  { %2322 = vmatpush3.bf16.msra.mxu0 %v2543_v50  ;;  %v2562_v44 = vld [vmem:[%s3419_s6 + $0x9c] sm:$0xff]   ;;  %v2572_v49 = vld [vmem:[%s3419_s6 + $0xc4] sm:$0xff]   ;;  %v2574_v50 = vld [vmem:[%s3419_s6 + $0xcc] ss:$0 sps:$4 sm:$0x33]  }
  0x77   :  { %2323 = vmatprep.subr.bf16.mxu0 %v2673_v6  ;;  %v2570_v48 = vld [vmem:[%s3419_s6 + $0xbc] sm:$0xff]   ;;  %v2578_v54 = vld [vmem:[%s3419_s6 + $0x10c] sm:$0xff]   ;;  %v2592_v63 = vld [vmem:[%s3419_s6 + $0x174] sm:$0xff]  }
  0x78   :  { %v2611_v41 = vld [vmem:[%s3421_s8 + $0x9c] sm:$0xff]  }
  0x7a   :  { %2324 = vmatpush3.bf16.msra.mxu0 %v2544_v51  ;;  %v629_v51 = vsel %vm372_vm2, %v2574_v50, 0  ;;  %v2615_v50 = vld [vmem:[%s3421_s8 + $0xbc] sm:$0xff]  }
  0x7b   :  { %2325 = vmatprep.subr.bf16.mxu0 %v2673_v6 }
  0x7e   :  { %2326 = vmatpush3.bf16.msra.mxu0 %v2545_v52  ;;  %v220_v52 = vld [vmem:[%s3420_s7 + $0x3] sm:$0x1] }
  0x7f   :  { %2327 = vmatprep.subr.bf16.mxu0 %v2673_v6 }
  0x82   :  { %2328 = vmatpush3.bf16.msra.mxu0 %v2546_v53  ;;  %v2576_v53 = vld [vmem:[%s3419_s6 + $0x104] sm:$0xff]  }
  0x83   :  { %2329 = vmatprep.subr.bf16.mxu0 %v2673_v6 }
  0x86   :  { %2330 = vmatpush3.bf16.msra.mxu0 %v884_v55  ;;  %v2580_v55 = vld [vmem:[%s3419_s6 + $0x114] sm:$0xff]  }
  0x87   :  { %2353 = vmatprep.subr.bf16.mxu0 %v2673_v6 }
  0x89   :  { %2332 = vmatmul.mubr.msk.bf16.vlgmr.msra.gmra.mrb[16].mxu0 %vm368_vm3, %v223_v56  ;;  %v2582_v56 = vld [vmem:[%s3419_s6 + $0x11c] sm:$0xff]  }
  0x8a   :  { %2354 = vmatpush3.bf16.msra.mxu0 %v2549_v57  ;;  %2367 = vmatprep.mubr.msk.bf16.mxu0 %vm2672_vm0, %v2673_v6  ;;  %v2584_v57 = vld [vmem:[%s3419_s6 + $0x124] sm:$0xff]  }
  0x8b   :  { %2355 = vmatprep.subr.bf16.mxu0 %v2673_v6 }
  0x8e   :  { %2356 = vmatpush3.bf16.msra.mxu0 %v2551_v58  ;;  %v2586_v58 = vld [vmem:[%s3419_s6 + $0x12c] sm:$0xff]  }
  0x8f   :  { %2357 = vmatprep.subr.bf16.mxu0 %v2673_v6 }
  0x92   :  { %2358 = vmatpush3.bf16.msra.mxu0 %v2553_v59  ;;  %v2588_v59 = vld [vmem:[%s3419_s6 + $0x134] ss:$0 sps:$4 sm:$0x33]  }
  0x93   :  { %2359 = vmatprep.subr.bf16.mxu0 %v2673_v6 }
  0x96   :  { %2360 = vmatpush3.bf16.msra.mxu0 %v2555_v60  ;;  %v799_v60 = vsel %vm372_vm2, %v2588_v59, 0  ;;  %v1014_v59 = vld [vmem:[%s3422_s9 + $0x3] sm:$0x1] }
  0x97   :  { %2361 = vmatprep.subr.bf16.mxu0 %v2673_v6 }
  0x9a   :  { %2362 = vmatpush3.bf16.msra.mxu0 %v2557_v61  ;;  %v222_v61 = vld [vmem:[%s3420_s7 + $0x5] sm:$0x1] }
  0x9b   :  { %2363 = vmatprep.subr.bf16.mxu0 %v2673_v6 }
  0x9e   :  { %2364 = vmatpush3.bf16.msra.mxu0 %v2559_v62  ;;  %v2590_v62 = vld [vmem:[%s3419_s6 + $0x16c] sm:$0xff]  }
  0x9f   :  { %2365 = vmatprep.subr.bf16.mxu0 %v2673_v6 }
  0xa2   :  { %2366 = vmatpush3.bf16.msra.mxu0 %v1166_v0  ;;  %v2594_v0 = vld [vmem:[%s3419_s6 + $0x17c] sm:$0xff]  }
  0xa3   :  { %2389 = vmatprep.subr.bf16.mxu0 %v2673_v6 }
  0xa5   :  { %2368 = vmatmul.mubr.msk.bf16.vlgmr.msra.gmra.mrb[20].mxu0 %vm368_vm3, %v1011_v1  ;;  %v2596_v1 = vld [vmem:[%s3419_s6 + $0x184] sm:$0xff]  }
  0xa6   :  { %2390 = vmatpush3.bf16.msra.mxu0 %v2563_v2  ;;  %2403 = vmatprep.mubr.msk.bf16.mxu0 %vm2672_vm0, %v2673_v6 }
  0xa7   :  { %2391 = vmatprep.subr.bf16.mxu0 %v2673_v6 }
  0xaa   :  { %2392 = vmatpush3.bf16.msra.mxu0 %v2565_v3 }
  0xab   :  { %2393 = vmatprep.subr.bf16.mxu0 %v2673_v6 }
  0xae   :  { %2394 = vmatpush3.bf16.msra.mxu0 %v2567_v4 }
  0xaf   :  { %2395 = vmatprep.subr.bf16.mxu0 %v2673_v6 }
  0xb2   :  { %2396 = vmatpush3.bf16.msra.mxu0 %v2569_v5 }
  0xb3   :  { %2397 = vmatprep.subr.bf16.mxu0 %v2673_v6 }
  0xb6   :  { %2398 = vmatpush3.bf16.msra.mxu0 %v2571_v7  ;;  %v2598_v7 = vld [vmem:[%s3419_s6 + $0x18c] sm:$0xff]  }
  0xb7   :  { %2399 = vmatprep.subr.bf16.mxu0 %v2673_v6 }
  0xba   :  { %2400 = vmatpush3.bf16.msra.mxu0 %v2573_v8 }
  0xbb   :  { %2401 = vmatprep.subr.bf16.mxu0 %v2673_v6 }
  0xbe   :  { %2402 = vmatpush3.bf16.msra.mxu0 %v1336_v10 }
  0xbf   :  { %2425 = vmatprep.subr.bf16.mxu0 %v2673_v6 }
  0xc1   :  { %2404 = vmatmul.mubr.msk.bf16.vlgmr.msra.gmra.mrb[24].mxu0 %vm368_vm3, %v1013_v11 }
  0xc2   :  { %2426 = vmatpush3.bf16.msra.mxu0 %v2577_v12  ;;  %2439 = vmatprep.mubr.msk.bf16.mxu0 %vm2672_vm0, %v2673_v6  ;;  %v2600_v12 = vld [vmem:[%s3419_s6 + $0x194] sm:$0xff]  }
  0xc3   :  { %2427 = vmatprep.subr.bf16.mxu0 %v2673_v6 }
  0xc6   :  { %2428 = vmatpush3.bf16.msra.mxu0 %v2579_v13 }
  0xc7   :  { %2429 = vmatprep.subr.bf16.mxu0 %v2673_v6 }
  0xca   :  { %2430 = vmatpush3.bf16.msra.mxu0 %v2581_v14  ;;  %v2602_v14 = vld [vmem:[%s3419_s6 + $0x19c] ss:$0 sps:$4 sm:$0x33]  }
  0xcb   :  { %2431 = vmatprep.subr.bf16.mxu0 %v2673_v6  ;;  %v969_v18 = vsel %vm372_vm2, %v2602_v14, 0 }
  0xce   :  { %2432 = vmatpush3.bf16.msra.mxu0 %v2583_v15 }
  0xcf   :  { %2433 = vmatprep.subr.bf16.mxu0 %v2673_v6 }
  0xd2   :  { %2434 = vmatpush3.bf16.msra.mxu0 %v2585_v16 }
  0xd3   :  { %2435 = vmatprep.subr.bf16.mxu0 %v2673_v6 }
  0xd6   :  { %2436 = vmatpush3.bf16.msra.mxu0 %v2587_v17 }
  0xd7   :  { %2437 = vmatprep.subr.bf16.mxu0 %v2673_v6 }
  0xda   :  { %2438 = vmatpush3.bf16.msra.mxu0 %v1506_v19 }
  0xdb   :  { %2461 = vmatprep.subr.bf16.mxu0 %v2673_v6 }
  0xdd   :  { %2440 = vmatmul.mubr.msk.bf16.vlgmr.msra.gmra.mrb[28].mxu0 %vm368_vm3, %v1015_v20 }
  0xde   :  { %2462 = vmatpush3.bf16.msra.mxu0 %v2591_v21  ;;  %2475 = vmatprep.mubr.msk.bf16.mxu0 %vm2672_vm0, %v2673_v6  ;;  %v224_v21 = vld [vmem:[%s3420_s7 + $0x7] sm:$0x1] }
  0xdf   :  { %2463 = vmatprep.subr.bf16.mxu0 %v2673_v6 }
  0xe2   :  { %2464 = vmatpush3.bf16.msra.mxu0 %v2593_v22  ;;  %v2604_v22 = vld [vmem:[%s3421_s8 + $0x34] sm:$0xff]  }
  0xe3   :  { %2465 = vmatprep.subr.bf16.mxu0 %v2673_v6 }
  0xe6   :  { %2466 = vmatpush3.bf16.msra.mxu0 %v2595_v23 }
  0xe7   :  { %2467 = vmatprep.subr.bf16.mxu0 %v2673_v6 }
  0xea   :  { %2468 = vmatpush3.bf16.msra.mxu0 %v2597_v24 }
  0xeb   :  { %2469 = vmatprep.subr.bf16.mxu0 %v2673_v6 }
  0xec   :  { %v123_v27 = vpop.f32.mrb[0].mxu0 }
  0xed   :  { %v124_v28 = vadd.f32 %v1903_v25, %v123_v27  ;;  %v2189_v29 = vpop.f32.mrb[1].mxu0  ;;  %v2605_v25 = vld [vmem:[%s3421_s8 + $0x3c] sm:$0xff]   ;;  %v2607_v27 = vld [vmem:[%s3421_s8 + $0x4c] sm:$0xff]  }
  0xee   :  { %2470 = vmatpush3.bf16.msra.mxu0 %v2599_v26  ;;  %v2606_v26 = vld [vmem:[%s3421_s8 + $0x44] sm:$0xff]   ;;  %v2609_v29 = vld [vmem:[%s3421_s8 + $0x5c] sm:$0xff]  }
  0xef   :  { %v127_v31 = vmax.f32 %v124_v28, 0.0  ;;  %2471 = vmatprep.subr.bf16.mxu0 %v2673_v6  ;;  %v2608_v28 = vld [vmem:[%s3421_s8 + $0x54] sm:$0xff]  }
  0xf1   :  { %2207 = vmatmul.mubr.msk.f32.vlgmr.msra.gmra.mrb[0].mxu1 %vm143_vm4, %v127_v31  ;;  %v3235_v31 = vstv %s1803_s26 }
  0xf2   :  { %2228 = vmatpush3.bf16.msra.mxu1 %v2548_v30  ;;  %2241 = vmatprep.mubr.msk.bf16.mxu1 %vm2672_vm0, %v2673_v6  ;;  %v2610_v30 = vld [vmem:[%s3421_s8 + $0x64] ss:$0 sps:$4 sm:$0x33]  }
  0xf3   :  { %2229 = vmatprep.subr.bf16.mxu1 %v2673_v6  ;;  %2472 = vmatpush3.bf16.msra.mxu0 %v2601_v32  ;;  %v3237_v32 = vstv %s2035_s2  ;;  %v1251_v33 = vsel %vm372_vm2, %v2610_v30, 0  ;;  %v2631_v30 = vld [vmem:[%s3421_s8 + $0x19c] ss:$0 sps:$4 sm:$0x33]  }
  0xf4   :  { %2473 = vmatprep.subr.bf16.mxu0 %v2673_v6 }
  0xf6   :  { %2230 = vmatpush3.bf16.msra.mxu1 %v2550_v34 }
  0xf7   :  { %2231 = vmatprep.subr.bf16.mxu1 %v2673_v6  ;;  %2474 = vmatpush3.bf16.msra.mxu0 %v1676_v35 }
  0xfa   :  { %2232 = vmatpush3.bf16.msra.mxu1 %v2552_v36  ;;  %2476 = vmatmul.mubr.msk.bf16.vlgmr.msra.gmra.mrb[32].mxu0 %vm368_vm3, %v1017_v37  ;;  %v3242_v36 = vstv %s2036_s28 }
  0xfb   :  { %2233 = vmatprep.subr.bf16.mxu1 %v2673_v6 }
  0xfe   :  { %2234 = vmatpush3.bf16.msra.mxu1 %v2554_v38 }
  0xff   :  { %2235 = vmatprep.subr.bf16.mxu1 %v2673_v6 }
 0x102   :  { %2236 = vmatpush3.bf16.msra.mxu1 %v2556_v39 }
 0x103   :  { %2237 = vmatprep.subr.bf16.mxu1 %v2673_v6 }
 0x106   :  { %2238 = vmatpush3.bf16.msra.mxu1 %v2558_v40  ;;  %v1012_v40 = vld [vmem:[%s3422_s9 + $0x1] sm:$0x1] }
 0x107   :  { %2239 = vmatprep.subr.bf16.mxu1 %v2673_v6 }
 0x108   :  { %v410_v2 = vpop.f32.mrb[4].mxu0 }
 0x109   :  { %v2225_v3 = vpop.f32.mrb[5].mxu0  ;;  %v1807_v34 = vmul.f32 %v3235_v31, %v410_v2 }
 0x10a   :  { %2240 = vmatpush3.bf16.msra.mxu1 %v459_v42  ;;  %v413_v4 = vpop.f32.mrb[6].mxu0  ;;  %v2620_v3 = vld [vmem:[%s3421_s8 + $0x114] sm:$0xff]  }
 0x10b   :  { %2263 = vmatprep.subr.bf16.mxu1 %v2673_v6  ;;  %v2226_v5 = vpop.f32.mrb[7].mxu0  ;;  %v2621_v4 = vld [vmem:[%s3421_s8 + $0x11c] sm:$0xff]  }
 0x10c   :  { %v2622_v5 = vld [vmem:[%s3421_s8 + $0x124] sm:$0xff]  }
 0x10d   :  { %2242 = vmatmul.mubr.msk.bf16.vlgmr.msra.gmra.mrb[4].mxu1 %vm368_vm3, %v218_v43 }
 0x10e   :  { %2264 = vmatpush3.bf16.msra.mxu1 %v2562_v44  ;;  %2277 = vmatprep.mubr.msk.bf16.mxu1 %vm2672_vm0, %v2673_v6 }
 0x10f   :  { %2265 = vmatprep.subr.bf16.mxu1 %v2673_v6 }
 0x112   :  { %2266 = vmatpush3.bf16.msra.mxu1 %v2564_v45 }
 0x113   :  { %2267 = vmatprep.subr.bf16.mxu1 %v2673_v6 }
 0x116   :  { %2268 = vmatpush3.bf16.msra.mxu1 %v2566_v46 }
 0x117   :  { %2269 = vmatprep.subr.bf16.mxu1 %v2673_v6 }
 0x11a   :  { %2270 = vmatpush3.bf16.msra.mxu1 %v2568_v47  ;;  %v2612_v47 = vld [vmem:[%s3421_s8 + $0xa4] sm:$0xff]  }
 0x11b   :  { %2271 = vmatprep.subr.bf16.mxu1 %v2673_v6 }
 0x11e   :  { %2272 = vmatpush3.bf16.msra.mxu1 %v2570_v48  ;;  %v2613_v48 = vld [vmem:[%s3421_s8 + $0xac] sm:$0xff]  }
 0x11f   :  { %2273 = vmatprep.subr.bf16.mxu1 %v2673_v6 }
 0x122   :  { %2274 = vmatpush3.bf16.msra.mxu1 %v2572_v49  ;;  %v2614_v49 = vld [vmem:[%s3421_s8 + $0xb4] sm:$0xff]  }
 0x123   :  { %2275 = vmatprep.subr.bf16.mxu1 %v2673_v6 }
 0x124   :  { %v3186_v8 = vpop.f32.mrb[8].mxu0 }
 0x125   :  { %v2261_v9 = vpop.f32.mrb[9].mxu0 }
 0x126   :  { %2276 = vmatpush3.bf16.msra.mxu1 %v629_v51  ;;  %v583_v10 = vpop.f32.mrb[10].mxu0  ;;  %v2616_v51 = vld [vmem:[%s3421_s8 + $0xc4] sm:$0xff]  }
 0x127   :  { %2299 = vmatprep.subr.bf16.mxu1 %v2673_v6  ;;  %v2262_v11 = vpop.f32.mrb[11].mxu0 }
 0x129   :  { %2278 = vmatmul.mubr.msk.bf16.vlgmr.msra.gmra.mrb[8].mxu1 %vm368_vm3, %v220_v52  ;;  %v2617_v52 = vld [vmem:[%s3421_s8 + $0xcc] ss:$0 sps:$4 sm:$0x33]  }
 0x12a   :  { %2300 = vmatpush3.bf16.msra.mxu1 %v2576_v53  ;;  %2313 = vmatprep.mubr.msk.bf16.mxu1 %vm2672_vm0, %v2673_v6  ;;  %v1421_v53 = vsel %vm372_vm2, %v2617_v52, 0 }
 0x12b   :  { %2301 = vmatprep.subr.bf16.mxu1 %v2673_v6 }
 0x12e   :  { %2302 = vmatpush3.bf16.msra.mxu1 %v2578_v54  ;;  %v1809_v54 = vmul.f32 %v3235_v31, %v3186_v8 }
 0x12f   :  { %2303 = vmatprep.subr.bf16.mxu1 %v2673_v6 }
 0x132   :  { %2304 = vmatpush3.bf16.msra.mxu1 %v2580_v55 }
 0x133   :  { %2305 = vmatprep.subr.bf16.mxu1 %v2673_v6 }
 0x136   :  { %2306 = vmatpush3.bf16.msra.mxu1 %v2582_v56 }
 0x137   :  { %2307 = vmatprep.subr.bf16.mxu1 %v2673_v6 }
 0x13a   :  { %2308 = vmatpush3.bf16.msra.mxu1 %v2584_v57 }
 0x13b   :  { %2309 = vmatprep.subr.bf16.mxu1 %v2673_v6 }
 0x13e   :  { %2310 = vmatpush3.bf16.msra.mxu1 %v2586_v58 }
 0x13f   :  { %2311 = vmatprep.subr.bf16.mxu1 %v2673_v6 }
 0x140   :  { %v3192_v13 = vpop.f32.mrb[12].mxu0 }
 0x141   :  { %v2297_v15 = vpop.f32.mrb[13].mxu0  ;;  %v1811_v10 = vmul.f32 %v3235_v31, %v3192_v13 }
 0x142   :  { %2312 = vmatpush3.bf16.msra.mxu1 %v799_v60  ;;  %v753_v16 = vpop.f32.mrb[14].mxu0  ;;  %v2618_v60 = vld [vmem:[%s3421_s8 + $0x104] sm:$0xff]  }
 0x143   :  { %2335 = vmatprep.subr.bf16.mxu1 %v2673_v6  ;;  %v2298_v17 = vpop.f32.mrb[15].mxu0  ;;  %v1016_v16 = vld [vmem:[%s3422_s9 + $0x5] sm:$0x1] }
 0x144   :  { %v2625_v17 = vld [vmem:[%s3421_s8 + $0x16c] sm:$0xff]  }
 0x145   :  { %2314 = vmatmul.mubr.msk.bf16.vlgmr.msra.gmra.mrb[12].mxu1 %vm368_vm3, %v222_v61 }
 0x146   :  { %2336 = vmatpush3.bf16.msra.mxu1 %v2590_v62  ;;  %2349 = vmatprep.mubr.msk.bf16.mxu1 %vm2672_vm0, %v2673_v6 }
 0x147   :  { %2337 = vmatprep.subr.bf16.mxu1 %v2673_v6 }
 0x14a   :  { %2338 = vmatpush3.bf16.msra.mxu1 %v2592_v63 }
 0x14b   :  { %2339 = vmatprep.subr.bf16.mxu1 %v2673_v6 }
 0x14e   :  { %2340 = vmatpush3.bf16.msra.mxu1 %v2594_v0 }
 0x14f   :  { %2341 = vmatprep.subr.bf16.mxu1 %v2673_v6 }
 0x152   :  { %2342 = vmatpush3.bf16.msra.mxu1 %v2596_v1 }
 0x153   :  { %2343 = vmatprep.subr.bf16.mxu1 %v2673_v6 }
 0x156   :  { %2344 = vmatpush3.bf16.msra.mxu1 %v2598_v7  ;;  %v2623_v7 = vld [vmem:[%s3421_s8 + $0x12c] sm:$0xff]  }
 0x157   :  { %2345 = vmatprep.subr.bf16.mxu1 %v2673_v6 }
 0x15a   :  { %2346 = vmatpush3.bf16.msra.mxu1 %v2600_v12 }
 0x15b   :  { %2347 = vmatprep.subr.bf16.mxu1 %v2673_v6 }
 0x15c   :  { %v3200_v19 = vpop.f32.mrb[16].mxu0 }
 0x15d   :  { %v2333_v20 = vpop.f32.mrb[17].mxu0 }
 0x15e   :  { %2348 = vmatpush3.bf16.msra.mxu1 %v969_v18  ;;  %v923_v23 = vpop.f32.mrb[18].mxu0 }
 0x15f   :  { %2371 = vmatprep.subr.bf16.mxu1 %v2673_v6  ;;  %v2334_v24 = vpop.f32.mrb[19].mxu0  ;;  %v2626_v23 = vld [vmem:[%s3421_s8 + $0x174] sm:$0xff]  }
 0x160   :  { %v2627_v24 = vld [vmem:[%s3421_s8 + $0x17c] sm:$0xff]  }
 0x161   :  { %2350 = vmatmul.mubr.msk.bf16.vlgmr.msra.gmra.mrb[16].mxu1 %vm368_vm3, %v224_v21 }
 0x162   :  { %2372 = vmatpush3.bf16.msra.mxu1 %v2604_v22  ;;  %2385 = vmatprep.mubr.msk.bf16.mxu1 %vm2672_vm0, %v2673_v6 }
 0x163   :  { %2373 = vmatprep.subr.bf16.mxu1 %v2673_v6 }
 0x166   :  { %2374 = vmatpush3.bf16.msra.mxu1 %v2605_v25  ;;  %v2628_v25 = vld [vmem:[%s3421_s8 + $0x184] sm:$0xff]  }
 0x167   :  { %2375 = vmatprep.subr.bf16.mxu1 %v2673_v6 }
 0x16a   :  { %2376 = vmatpush3.bf16.msra.mxu1 %v2606_v26  ;;  %v2629_v26 = vld [vmem:[%s3421_s8 + $0x18c] sm:$0xff]  }
 0x16b   :  { %2377 = vmatprep.subr.bf16.mxu1 %v2673_v6 }
 0x16e   :  { %2378 = vmatpush3.bf16.msra.mxu1 %v2607_v27 }
 0x16f   :  { %2379 = vmatprep.subr.bf16.mxu1 %v2673_v6 }
 0x172   :  { %2380 = vmatpush3.bf16.msra.mxu1 %v2608_v28 }
 0x173   :  { %2381 = vmatprep.subr.bf16.mxu1 %v2673_v6 }
 0x176   :  { %2382 = vmatpush3.bf16.msra.mxu1 %v2609_v29  ;;  %v2630_v29 = vld [vmem:[%s3421_s8 + $0x194] sm:$0xff]  }
 0x177   :  { %2383 = vmatprep.subr.bf16.mxu1 %v2673_v6 }
 0x178   :  { %v1202_v35 = vpop.f32.mrb[20].mxu0 }
 0x179   :  { %v1816_v37 = vmul.f32 %v3237_v32, %v1202_v35  ;;  %v1832_v38 = vmul.f32 %v1202_v35, %v410_v2  ;;  %v2369_v39 = vpop.f32.mrb[21].mxu0  ;;  %v2619_v2 = vld [vmem:[%s3421_s8 + $0x10c] sm:$0xff]  }
 0x17a   :  { %2384 = vmatpush3.bf16.msra.mxu1 %v1251_v33  ;;  %v1205_v42 = vpop.f32.mrb[22].mxu0  ;;  %v1761_v33 = vsel %vm372_vm2, %v2631_v30, 0 }
 0x17b   :  { %2407 = vmatprep.subr.bf16.mxu1 %v2673_v6  ;;  %v1824_v43 = vadd.f32 %v1816_v37, %v1807_v34  ;;  %v1841_v44 = vmul.f32 %v3242_v36, %v1832_v38  ;;  %v2370_v45 = vpop.f32.mrb[23].mxu0  ;;  %v1813_v34 = vmul.f32 %v3235_v31, %v3200_v19  ;;  %v1018_v37 = vld [vmem:[%s3422_s9 + $0x7] sm:$0x1] }
 0x17d   :  { %2386 = vmatmul.mubr.msk.bf16.vlgmr.msra.gmra.mrb[20].mxu1 %vm368_vm3, %v1012_v40  ;;  %v3254_v46 = vadd.f32 %v1841_v44, %v1824_v43 }
 0x17e   :  { %2408 = vmatpush3.bf16.msra.mxu1 %v2611_v41  ;;  %2421 = vmatprep.mubr.msk.bf16.mxu1 %vm2672_vm0, %v2673_v6 }
 0x17f   :  { %2409 = vmatprep.subr.bf16.mxu1 %v2673_v6 }
 0x182   :  { %2410 = vmatpush3.bf16.msra.mxu1 %v2612_v47 }
 0x183   :  { %2411 = vmatprep.subr.bf16.mxu1 %v2673_v6 }
 0x186   :  { %2412 = vmatpush3.bf16.msra.mxu1 %v2613_v48 }
 0x187   :  { %2413 = vmatprep.subr.bf16.mxu1 %v2673_v6 }
 0x18a   :  { %2414 = vmatpush3.bf16.msra.mxu1 %v2614_v49 }
 0x18b   :  { %2415 = vmatprep.subr.bf16.mxu1 %v2673_v6 }
 0x18e   :  { %2416 = vmatpush3.bf16.msra.mxu1 %v2615_v50 }
 0x18f   :  { %2417 = vmatprep.subr.bf16.mxu1 %v2673_v6 }
 0x192   :  { %2418 = vmatpush3.bf16.msra.mxu1 %v2616_v51 }
 0x193   :  { %2419 = vmatprep.subr.bf16.mxu1 %v2673_v6 }
 0x194   :  { %v1372_v55 = vpop.f32.mrb[24].mxu0 }
 0x195   :  { %v1818_v56 = vmul.f32 %v3237_v32, %v1372_v55  ;;  %v1834_v57 = vmul.f32 %v1372_v55, %v3186_v8  ;;  %v2405_v58 = vpop.f32.mrb[25].mxu0  ;;  %v2624_v8 = vld [vmem:[%s3421_s8 + $0x134] ss:$0 sps:$4 sm:$0x33]  }
 0x196   :  { %2420 = vmatpush3.bf16.msra.mxu1 %v1421_v53  ;;  %v1375_v61 = vpop.f32.mrb[26].mxu0  ;;  %v1591_v9 = vsel %vm372_vm2, %v2624_v8, 0 }
 0x197   :  { %2443 = vmatprep.subr.bf16.mxu1 %v2673_v6  ;;  %v1826_v62 = vadd.f32 %v1818_v56, %v1809_v54  ;;  %v1843_v63 = vmul.f32 %v3242_v36, %v1834_v57  ;;  %v2406_v0 = vpop.f32.mrb[27].mxu0 }
 0x199   :  { %2422 = vmatmul.mubr.msk.bf16.vlgmr.msra.gmra.mrb[24].mxu1 %vm368_vm3, %v1014_v59  ;;  %v3296_v1 = vadd.f32 %v1843_v63, %v1826_v62 }
 0x19a   :  { %2444 = vmatpush3.bf16.msra.mxu1 %v2618_v60  ;;  %2457 = vmatprep.mubr.msk.bf16.mxu1 %vm2672_vm0, %v2673_v6 }
 0x19b   :  { %2445 = vmatprep.subr.bf16.mxu1 %v2673_v6 }
 0x19e   :  { %2446 = vmatpush3.bf16.msra.mxu1 %v2619_v2 }
 0x19f   :  { %2447 = vmatprep.subr.bf16.mxu1 %v2673_v6 }
 0x1a2   :  { %2448 = vmatpush3.bf16.msra.mxu1 %v2620_v3 }
 0x1a3   :  { %2449 = vmatprep.subr.bf16.mxu1 %v2673_v6 }
 0x1a6   :  { %2450 = vmatpush3.bf16.msra.mxu1 %v2621_v4 }
 0x1a7   :  { %2451 = vmatprep.subr.bf16.mxu1 %v2673_v6 }
 0x1aa   :  { %2452 = vmatpush3.bf16.msra.mxu1 %v2622_v5 }
 0x1ab   :  { %2453 = vmatprep.subr.bf16.mxu1 %v2673_v6 }
 0x1ae   :  { %2454 = vmatpush3.bf16.msra.mxu1 %v2623_v7 }
 0x1af   :  { %2455 = vmatprep.subr.bf16.mxu1 %v2673_v6 }
 0x1b0   :  { %v1542_v11 = vpop.f32.mrb[28].mxu0 }
 0x1b1   :  { %v1820_v12 = vmul.f32 %v3237_v32, %v1542_v11  ;;  %v1836_v14 = vmul.f32 %v1542_v11, %v3192_v13  ;;  %v2441_v15 = vpop.f32.mrb[29].mxu0 }
 0x1b2   :  { %2456 = vmatpush3.bf16.msra.mxu1 %v1591_v9  ;;  %v1545_v18 = vpop.f32.mrb[30].mxu0 }
 0x1b3   :  { %2479 = vmatprep.subr.bf16.mxu1 %v2673_v6  ;;  %v1828_v20 = vadd.f32 %v1820_v12, %v1811_v10  ;;  %v1845_v21 = vmul.f32 %v3242_v36, %v1836_v14  ;;  %v2442_v22 = vpop.f32.mrb[31].mxu0  ;;  %v1868_v10 = vrot.slane %v3296_v1, 6 }
 0x1b5   :  { %2458 = vmatmul.mubr.msk.bf16.vlgmr.msra.gmra.mrb[28].mxu1 %vm368_vm3, %v1016_v16  ;;  %v3338_v13 = vadd.f32 %v1845_v21, %v1828_v20 }
 0x1b6   :  { %2480 = vmatpush3.bf16.msra.mxu1 %v2625_v17  ;;  %2493 = vmatprep.mubr.msk.bf16.mxu1 %vm2672_vm0, %v2673_v6 }
 0x1b7   :  { %2481 = vmatprep.subr.bf16.mxu1 %v2673_v6  ;;  %v1874_v1 = vrot.slane %v3338_v13, 4 }
 0x1ba   :  { %2482 = vmatpush3.bf16.msra.mxu1 %v2626_v23 }
 0x1bb   :  { %2483 = vmatprep.subr.bf16.mxu1 %v2673_v6 }
 0x1be   :  { %2484 = vmatpush3.bf16.msra.mxu1 %v2627_v24 }
 0x1bf   :  { %2485 = vmatprep.subr.bf16.mxu1 %v2673_v6 }
 0x1c2   :  { %2486 = vmatpush3.bf16.msra.mxu1 %v2628_v25 }
 0x1c3   :  { %2487 = vmatprep.subr.bf16.mxu1 %v2673_v6 }
 0x1c4   :  { %v3358_v27 = vpop.f32.mrb[0].mxu1 }
 0x1c5   :  { %v2208_v28 = vpop.f32.mrb[1].mxu1 }
 0x1c6   :  { %2488 = vmatpush3.bf16.msra.mxu1 %v2629_v26 }
 0x1c7   :  { %2489 = vmatprep.subr.bf16.mxu1 %v2673_v6 }
 0x1ca   :  { %2490 = vmatpush3.bf16.msra.mxu1 %v2630_v29 }
 0x1cb   :  { %2491 = vmatprep.subr.bf16.mxu1 %v2673_v6 }
 0x1cd   :  { %v1712_v35 = vpop.f32.mrb[32].mxu0 }
 0x1ce   :  { %2492 = vmatpush3.bf16.msra.mxu1 %v1761_v33  ;;  %v1822_v38 = vmul.f32 %v3237_v32, %v1712_v35  ;;  %v1838_v39 = vmul.f32 %v1712_v35, %v3200_v19  ;;  %v2477_v40 = vpop.f32.mrb[33].mxu0 }
 0x1cf   :  { %v1715_v41 = vpop.f32.mrb[34].mxu0 }
 0x1d0   :  { %v1830_v42 = vadd.f32 %v1822_v38, %v1813_v34  ;;  %v1847_v6 = vmul.f32 %v3242_v36, %v1838_v39  ;;  %v2478_v43 = vpop.f32.mrb[35].mxu0 }
 0x1d1   :  { %2494 = vmatmul.mubr.msk.bf16.vlgmr.msra.gmra.mrb[32].mxu1 %vm368_vm3, %v1018_v37 }
 0x1d2   :  { %v3378_v44 = vadd.f32 %v1847_v6, %v1830_v42 }
 0x1d4   :  { %v1880_v13 = vrot.slane %v3378_v44, 2 }
 0x1e0   :  { %v495_v45 = vpop.f32.mrb[4].mxu1 }
 0x1e1   :  { %v2243_v47 = vpop.f32.mrb[5].mxu1  ;;  %v1808_v62 = vmul.f32 %v3235_v31, %v495_v45 }
 0x1e2   :  { %v498_v48 = vpop.f32.mrb[6].mxu1 }
 0x1e3   :  { %v2244_v49 = vpop.f32.mrb[7].mxu1 }
 0x1fc   :  { %v665_v50 = vpop.f32.mrb[8].mxu1 }
 0x1fd   :  { %v2279_v51 = vpop.f32.mrb[9].mxu1  ;;  %v1810_v15 = vmul.f32 %v3235_v31, %v665_v50 }
 0x1fe   :  { %v668_v52 = vpop.f32.mrb[10].mxu1 }
 0x1ff   :  { %v2280_v53 = vpop.f32.mrb[11].mxu1 }
 0x218   :  { %v835_v54 = vpop.f32.mrb[12].mxu1 }
 0x219   :  { %v2315_v19 = vpop.f32.mrb[13].mxu1  ;;  %v1812_v29 = vmul.f32 %v3235_v31, %v835_v54 }
 0x21a   :  { %v838_v55 = vpop.f32.mrb[14].mxu1 }
 0x21b   :  { %v2316_v56 = vpop.f32.mrb[15].mxu1 }
 0x234   :  { %v1005_v57 = vpop.f32.mrb[16].mxu1 }
 0x235   :  { %v2351_v58 = vpop.f32.mrb[17].mxu1 }
 0x236   :  { %v1008_v59 = vpop.f32.mrb[18].mxu1 }
 0x237   :  { %v2352_v60 = vpop.f32.mrb[19].mxu1 }
 0x250   :  { %v1287_v61 = vpop.f32.mrb[20].mxu1 }
 0x251   :  { %v1817_v63 = vmul.f32 %v3237_v32, %v1287_v61  ;;  %v1833_v0 = vmul.f32 %v1287_v61, %v495_v45  ;;  %v2387_v2 = vpop.f32.mrb[21].mxu1  ;;  %v1814_v45 = vmul.f32 %v3235_v31, %v1005_v57 }
 0x252   :  { %v1290_v3 = vpop.f32.mrb[22].mxu1 }
 0x253   :  { %v1825_v4 = vadd.f32 %v1817_v63, %v1808_v62  ;;  %v1842_v5 = vmul.f32 %v3242_v36, %v1833_v0  ;;  %v2388_v7 = vpop.f32.mrb[23].mxu1 }
 0x255   :  { %v1850_v8 = vadd.f32 %v1842_v5, %v1825_v4 }
 0x257   :  { %v1865_v9 = vrot.slane %v1850_v8, 7 }
 0x259   :  { %v1867_v11 = vsel %vm1866_vm5, %v1865_v9, %v3254_v46 }
 0x25a   :  { %v1870_v12 = vsel %vm1869_vm6, %v1868_v10, %v1867_v11 }
 0x26c   :  { %v1457_v14 = vpop.f32.mrb[24].mxu1 }
 0x26d   :  { %v1819_v16 = vmul.f32 %v3237_v32, %v1457_v14  ;;  %v1835_v17 = vmul.f32 %v1457_v14, %v665_v50  ;;  %v2423_v18 = vpop.f32.mrb[25].mxu1 }
 0x26e   :  { %v1460_v20 = vpop.f32.mrb[26].mxu1 }
 0x26f   :  { %v1827_v21 = vadd.f32 %v1819_v16, %v1810_v15  ;;  %v1844_v22 = vmul.f32 %v3242_v36, %v1835_v17  ;;  %v2424_v23 = vpop.f32.mrb[27].mxu1 }
 0x271   :  { %v1852_v24 = vadd.f32 %v1844_v22, %v1827_v21 }
 0x273   :  { %v1871_v25 = vrot.slane %v1852_v24, 5 }
 0x275   :  { %v1873_v46 = vsel %vm1872_vm7, %v1871_v25, %v1870_v12 }
 0x276   :  { %v1876_v26 = vsel %vm1875_vm8, %v1874_v1, %v1873_v46 }
 0x288   :  { %v1627_v28 = vpop.f32.mrb[28].mxu1 }
 0x289   :  { %v1821_v30 = vmul.f32 %v3237_v32, %v1627_v28  ;;  %v1837_v33 = vmul.f32 %v1627_v28, %v835_v54  ;;  %v2459_v34 = vpop.f32.mrb[29].mxu1  ;;  %v1905_v54 = vld [vmem:[%s3418_s5] ss:$0 sm:$0xff] }
 0x28a   :  { %v1630_v35 = vpop.f32.mrb[30].mxu1  ;;  %v214_v31 = vadd.f32 %v1905_v54, %v3358_v27 }
 0x28b   :  { %v1829_v37 = vadd.f32 %v1821_v30, %v1812_v29  ;;  %v1846_v38 = vmul.f32 %v3242_v36, %v1837_v33  ;;  %v2460_v39 = vpop.f32.mrb[31].mxu1 }
 0x28d   :  { %v1854_v40 = vadd.f32 %v1846_v38, %v1829_v37 }
 0x28f   :  { %v1877_v41 = vrot.slane %v1854_v40, 3 }
 0x291   :  { %v1879_v42 = vsel %vm1878_vm9, %v1877_v41, %v1876_v26 }
 0x292   :  { %v1882_v6 = vsel %vm1881_vm10, %v1880_v13, %v1879_v42 }
 0x2a4   :  { %v1797_v43 = vpop.f32.mrb[32].mxu1 }
 0x2a5   :  { %v1823_v47 = vmul.f32 %v3237_v32, %v1797_v43  ;;  %v1839_v48 = vmul.f32 %v1797_v43, %v1005_v57  ;;  %v2495_v49 = vpop.f32.mrb[33].mxu1 }
 0x2a6   :  { %v1800_v50 = vpop.f32.mrb[34].mxu1 }
 0x2a7   :  { %v1831_v51 = vadd.f32 %v1823_v47, %v1814_v45  ;;  %v1848_v52 = vmul.f32 %v3242_v36, %v1839_v48  ;;  %v2496_v53 = vpop.f32.mrb[35].mxu1 }
 0x2a9   :  { %v1856_v19 = vadd.f32 %v1848_v52, %v1831_v51 }
 0x2ab   :  { %v1883_v44 = vrot.slane %v1856_v19, 1 }
 0x2ad   :  { %v1885_v55 = vsel %vm1884_vm11, %v1883_v44, %v1882_v6 }
 0x2ae   :  { %v1887_v32 = vmul.f32 %v1885_v55, %v214_v31 }
 0x2b0   :  { %1888 = vst.msk [vmem:[#allocation4] sm:$0xff] %vm53_vm1, %v1887_v32 }
 0x2b1   :  { %2655 = shalt.err (!%p2652_p9)
}
 0x2b2   :  { %s2656_s12 = scalar_lea.hbm %s3423_s10, 128 }
 0x2b3   :  { %p2657_p10 = scmp.ne.s32.totalorder %s3423_s10, %s2656_s12  ;;  %p2660_p11 = scmp.lt.u32.totalorder %s2656_s12, %s3423_s10 }
 0x2b5   :  { %p2662_p12 = pnand %p2660_p11, %p2657_p10 }
 0x2b7   :  { %2665 = shalt.err (!%p2662_p12)
}
 0x2b8   :  { %1898 = dma.vmem_to_hbm [thread:$0]  %s1896_s1, 128, %s3423_s10, [#allocation5]  }
 0x2b9   :  { %2668 = dma.done.wait [#allocation5], 128  }
 0x2ba   :  { %2669 = vsyncadd [#allocation5], 4294967168 }
 0x2bb   :  { %1902 = vsyncpa [#allocation5], 1 }

</bundles_post_ra>
